<compile_context>
chip_gen: v6e
topology: v6e:2x2x1
jax: 0.10.0
libtpu: 0.0.40
codegen_flags: <defaults>
</compile_context>

<pallas_src>
from dataclasses import dataclass

import jax
import jax.numpy as jnp
from jax.experimental import pallas as pl
from jax.experimental.pallas import tpu as pltpu


# --------------------------------------------------------------------------
# Kernels
# --------------------------------------------------------------------------

def _mlp_resident_kernel(x_ref, w12_ref, b12_ref, w3_ref, b3_ref, o_ref):
    # x_ref:   (tm, D)   bf16 token tile
    # w12_ref: (D, 2H)   bf16 fused gate/up weight (resident)
    # b12_ref: (1, 2H)   f32  fused gate/up bias
    # w3_ref:  (H, O)    bf16 down-projection weight (resident)
    # b3_ref:  (1, O)    f32  down-projection bias
    # o_ref:   (tm, O)   bf16 output tile
    H = w3_ref.shape[0]

    x = x_ref[...]                                                   # bf16
    # Single fused MXU matmul for w1 and w2; f32 accumulation.
    h = jnp.dot(x, w12_ref[...], preferred_element_type=jnp.float32)
    h = h + b12_ref[...]                                             # f32

    # Lane-aligned static split (H is a multiple of 128 for real model dims).
    h1 = h[:, :H]
    h2 = h[:, H:]

    # silu(h1) * h2: exp + reciprocal on the EUP slot, mul/add on the VPU.
    sig = pl.reciprocal(1.0 + jnp.exp(-h1), approx=True)
    gated = (h1 * sig) * h2

    out = jnp.dot(gated.astype(jnp.bfloat16), w3_ref[...],
                  preferred_element_type=jnp.float32)
    out = out + b3_ref[...]
    o_ref[...] = out.astype(o_ref.dtype)


def _mlp_streamed_kernel(x_ref, w1_ref, b1_ref, w2_ref, b2_ref,
                         w3_ref, b3_ref, o_ref, acc_ref):
    # Streamed-weights path: grid = (M tiles, H tiles), H last ("arbitrary").
    # x_ref:  (tm, D)  bf16   w1_ref/w2_ref: (D, th) bf16   b1/b2: (1, th) f32
    # w3_ref: (th, O)  bf16   b3_ref: (1, O) f32
    # o_ref:  (tm, O)  bf16   acc_ref: (tm, O) f32 scratch accumulator
    j = pl.program_id(1)

    @pl.when(j == 0)
    def _():
        acc_ref[...] = jnp.zeros_like(acc_ref)

    x = x_ref[...]
    h1 = jnp.dot(x, w1_ref[...], preferred_element_type=jnp.float32) + b1_ref[...]
    h2 = jnp.dot(x, w2_ref[...], preferred_element_type=jnp.float32) + b2_ref[...]

    sig = pl.reciprocal(1.0 + jnp.exp(-h1), approx=True)
    gated = (h1 * sig) * h2

    acc_ref[...] += jnp.dot(gated.astype(jnp.bfloat16), w3_ref[...],
                            preferred_element_type=jnp.float32)

    @pl.when(j == pl.num_programs(1) - 1)
    def _():
        o_ref[...] = (acc_ref[...] + b3_ref[...]).astype(o_ref.dtype)


# --------------------------------------------------------------------------
# pallas_call builders
# --------------------------------------------------------------------------

def _probe_kernel(x_ref, o_ref):
    o_ref[...] = x_ref[...] + 1.0


_BUFFERED1_SUPPORTED = None


def _buffered1_supported():
    """Feature-detect pl.Buffered(1) once with a tiny probe kernel (instead of
    a broad try/except around the real call)."""
    global _BUFFERED1_SUPPORTED
    if _BUFFERED1_SUPPORTED is None:
        try:
            spec = pl.BlockSpec((8, 128), lambda i: (0, 0),
                                pipeline_mode=pl.Buffered(1))
            out = pl.pallas_call(
                _probe_kernel,
                out_shape=jax.ShapeDtypeStruct((8, 128), jnp.float32),
                grid=(1,),
                in_specs=[spec],
                out_specs=pl.BlockSpec((8, 128), lambda i: (0, 0)),
            )(jnp.zeros((8, 128), jnp.float32))
            jax.block_until_ready(out)
            _BUFFERED1_SUPPORTED = True
        except Exception:  # probe only: any failure => default double-buffer
            _BUFFERED1_SUPPORTED = False
    return _BUFFERED1_SUPPORTED


def _resident_call(tm, M, D, H, O, out_dtype, vmem_limit, single_buf):
    if single_buf:
        def wspec(shape):
            # Grid-invariant operands: no double-buffering needed.
            return pl.BlockSpec(shape, lambda i: (0, 0),
                                pipeline_mode=pl.Buffered(1))
    else:
        def wspec(shape):
            return pl.BlockSpec(shape, lambda i: (0, 0))

    return pl.pallas_call(
        _mlp_resident_kernel,
        out_shape=jax.ShapeDtypeStruct((M, O), out_dtype),
        grid_spec=pltpu.PrefetchScalarGridSpec(
            num_scalar_prefetch=0,
            grid=(pl.cdiv(M, tm),),              # partial last block is masked
            in_specs=[
                pl.BlockSpec((tm, D), lambda i: (i, 0)),   # x tile (pipelined)
                wspec((D, 2 * H)),                         # w12 (resident)
                wspec((1, 2 * H)),                         # b12
                wspec((H, O)),                             # w3
                wspec((1, O)),                             # b3
            ],
            out_specs=pl.BlockSpec((tm, O), lambda i: (i, 0)),
        ),
        compiler_params=pltpu.CompilerParams(
            dimension_semantics=("parallel",),             # megacore over M
            vmem_limit_bytes=vmem_limit,
        ),
    )


def _streamed_call(tm, th, M, D, H, O, out_dtype, vmem_limit):
    return pl.pallas_call(
        _mlp_streamed_kernel,
        out_shape=jax.ShapeDtypeStruct((M, O), out_dtype),
        grid_spec=pltpu.PrefetchScalarGridSpec(
            num_scalar_prefetch=0,
            grid=(pl.cdiv(M, tm), H // th),       # H reduction axis last
            in_specs=[
                pl.BlockSpec((tm, D), lambda i, j: (i, 0)),   # x tile
                pl.BlockSpec((D, th), lambda i, j: (0, j)),   # w1 column tile
                pl.BlockSpec((1, th), lambda i, j: (0, j)),   # b1
                pl.BlockSpec((D, th), lambda i, j: (0, j)),   # w2 column tile
                pl.BlockSpec((1, th), lambda i, j: (0, j)),   # b2
                pl.BlockSpec((th, O), lambda i, j: (j, 0)),   # w3 row tile
                pl.BlockSpec((1, O), lambda i, j: (0, 0)),    # b3
            ],
            out_specs=pl.BlockSpec((tm, O), lambda i, j: (i, 0)),
            scratch_shapes=[pltpu.VMEM((tm, O), jnp.float32)],
        ),
        compiler_params=pltpu.CompilerParams(
            dimension_semantics=("parallel", "arbitrary"),
            vmem_limit_bytes=vmem_limit,
        ),
    )


# --------------------------------------------------------------------------
# Per-generation configuration
# --------------------------------------------------------------------------

@dataclass
class _Config:
    streamed: bool
    tm: int
    th: int
    vmem_limit: int
    single_buf: bool


def _vmem_budget_bytes():
    kind = ""
    try:
        kind = jax.devices()[0].device_kind.lower()
    except Exception:
        pass
    cap = None
    try:
        cap = int(pltpu.get_tpu_info().vmem_capacity_bytes)
    except Exception:
        cap = None
    is_v7 = ("v7" in kind) or ("tpu7" in kind)
    if cap is None:
        cap = (64 << 20) if is_v7 else (128 << 20)
    if is_v7:
        cap = min(cap, 64 << 20)   # per-TensorCore budget on v7x
    return cap


def _pick_config(M, D, H, O, *, force_streamed=False, tm=None, th=None):
    cap = _vmem_budget_bytes()
    big_vmem = cap >= (100 << 20)                 # v5e/v6e: 128 MiB; v7x: 64 MiB/TC
    vmem_limit = (112 << 20) if big_vmem else (48 << 20)
    budget = vmem_limit - (6 << 20)               # headroom for internal scratch
    two_tc = not big_vmem                         # v7x: keep both TensorCores busy

    single_buf = _buffered1_supported()
    w_mult = 1 if single_buf else 2

    def resident_bytes(t):
        return ((D * 2 * H + H * O) * 2 * w_mult           # bf16 resident weights
                + (2 * H + O) * 4 * w_mult                 # f32 biases
                + 2 * t * D * 2 + 2 * t * O * 2            # pipelined x / out tiles
                + t * 2 * H * 4 + t * H * 2)               # f32 h + bf16 gated live

    def streamed_bytes(t, s):
        return (2 * (2 * D * s + s * O) * 2                # double-buffered weight tiles
                + 2 * (2 * s + O) * 4
                + 2 * t * D * 2 + 2 * t * O * 2
                + t * O * 4                                # f32 accumulator
                + 2 * t * s * 4 + t * s * 2)               # f32 h1/h2 + bf16 gated live

    def pick_tm(fits):
        if tm is not None:
            return tm
        if M <= 128:
            return M
        cands = [512, 256, 128] if big_vmem else [256, 128]
        if two_tc:
            cands2 = [t for t in cands if -(-M // t) >= 2]
            if cands2:
                cands = cands2
        for t in cands:
            if fits(t):
                return t
        return cands[-1]

    streamed = force_streamed or (
        H % 128 == 0 and resident_bytes(min(M, 128)) > budget)
    # TODO(synk): if H is not a multiple of 128 and weights do not fit VMEM,
    # pad H (weights are zero-padded) before streaming; not needed here.

    if streamed:
        tm_ = pick_tm(lambda t: streamed_bytes(t, 128) <= budget)
        if th is None:
            th_ = 128
            for s in (1024, 512, 256):
                if H % s == 0 and streamed_bytes(tm_, s) <= budget:
                    th_ = s
                    break
        else:
            th_ = th
        assert H % th_ == 0, "H tile must divide H (reduction axis)"
        return _Config(True, tm_, th_, vmem_limit, single_buf)

    tm_ = pick_tm(lambda t: resident_bytes(t) <= budget)
    return _Config(False, tm_, 0, vmem_limit, single_buf)


# --------------------------------------------------------------------------
# Public wrapper
# --------------------------------------------------------------------------

def mlp_forward(x, w1, b1, w2, b2, w3, b3, *,
                out_dtype=jnp.bfloat16, tm=None, th=None,
                force_streamed=False):
    """x: (M, D) f32; w1/w2: (D, H); b1/b2: (H,) or (1, H);
    w3: (H, O); b3: (O,) or (1, O).  Returns (M, O) in `out_dtype`."""
    M, D = x.shape
    H = w1.shape[1]
    O = w3.shape[1]
    assert w1.shape == (D, H) and w2.shape == (D, H) and w3.shape == (H, O)

    # bf16 MXU operands (v6e/v7x fast path, half the weight DMA); f32 biases.
    xb = x.astype(jnp.bfloat16)
    w1b = w1.astype(jnp.bfloat16)
    w2b = w2.astype(jnp.bfloat16)
    w3b = w3.astype(jnp.bfloat16)
    b1f = b1.reshape(1, H).astype(jnp.float32)
    b2f = b2.reshape(1, H).astype(jnp.float32)
    b3f = b3.reshape(1, O).astype(jnp.float32)

    cfg = _pick_config(M, D, H, O, force_streamed=force_streamed, tm=tm, th=th)

    if cfg.streamed:
        call = _streamed_call(cfg.tm, cfg.th, M, D, H, O, out_dtype,
                              cfg.vmem_limit)
        return call(xb, w1b, b1f, w2b, b2f, w3b, b3f)

    # Resident path: fuse gate/up projections (one-time weight concat; for a
    # real deployment pre-fuse the weights offline).
    w12b = jnp.concatenate([w1b, w2b], axis=1)
    b12f = jnp.concatenate([b1f, b2f], axis=1)
    call = _resident_call(cfg.tm, M, D, H, O, out_dtype,
                          cfg.vmem_limit, cfg.single_buf)
    return call(xb, w12b, b12f, w3b, b3f)


# --------------------------------------------------------------------------
# References
# --------------------------------------------------------------------------

def _ref_forward_bf16(x, w1, b1, w2, b2, w3, b3):
    # Same compute path as the kernel (bf16 matmul operands, f32 accumulation
    # and f32 elementwise), expressed in plain JAX.
    h1 = jnp.dot(x.astype(jnp.bfloat16), w1.astype(jnp.bfloat16),
                 preferred_element_type=jnp.float32) + b1.reshape(1, -1)
    h2 = jnp.dot(x.astype(jnp.bfloat16), w2.astype(jnp.bfloat16),
                 preferred_element_type=jnp.float32) + b2.reshape(1, -1)
    g = (h1 * jax.nn.sigmoid(h1)) * h2
    return jnp.dot(g.astype(jnp.bfloat16), w3.astype(jnp.bfloat16),
                   preferred_element_type=jnp.float32) + b3.reshape(1, -1)


def _ref_forward_f32(x, w1, b1, w2, b2, w3, b3):
    h1 = x @ w1 + b1.reshape(1, -1)
    h2 = x @ w2 + b2.reshape(1, -1)
    return ((h1 * jax.nn.sigmoid(h1)) * h2) @ w3 + b3.reshape(1, -1)


# --------------------------------------------------------------------------
# Demo / self-test
# --------------------------------------------------------------------------

if __name__ == "__main__":
    # Small shapes consistent with the module:
    #   in_features=32, expansion=4 -> hidden=128, out_features=32
    #   tokens: batch=2, seq=8 -> M=16
    # (NOTE: D=O=32 < 128 lanes, so demo-shape timings are store-masked and
    #  not representative; real model dims are lane-dense.)
    B, S = 2, 8
    in_features, expansion, out_features = 32, 4, 32
    hidden = in_features * expansion

    key = jax.random.PRNGKey(0)
    kx, k1, kb1, k2, kb2, k3, kb3 = jax.random.split(key, 7)

    x = jax.random.normal(kx, (B, S, in_features), dtype=jnp.float32)

    def lin_init(kw, kb, fan_in, fan_out):
        bound = 1.0 / (fan_in ** 0.5)
        w = jax.random.uniform(kw, (fan_in, fan_out), jnp.float32, -bound, bound)
        b = jax.random.uniform(kb, (fan_out,), jnp.float32, -bound, bound)
        return w, b

    w1, b1 = lin_init(k1, kb1, in_features, hidden)
    w2, b2 = lin_init(k2, kb2, in_features, hidden)
    w3, b3 = lin_init(k3, kb3, hidden, out_features)

    x2d = x.reshape(B * S, in_features)

    # ---- resident-weights path (auto-selected for these tiny shapes) ----
    y = mlp_forward(x2d, w1, b1, w2, b2, w3, b3)
    y = jax.block_until_ready(y)
    yf = y.astype(jnp.float32).reshape(B, S, out_features)

    y_ref_bf16 = _ref_forward_bf16(x2d, w1, b1, w2, b2, w3, b3) \
        .reshape(B, S, out_features)
    assert jnp.allclose(yf, y_ref_bf16, atol=2e-2, rtol=2e-2), \
        "mismatch vs bf16-path reference"

    # Documented bf16-operand tolerance vs the pure-f32 PyTorch semantics.
    y_ref_f32 = _ref_forward_f32(x2d, w1, b1, w2, b2, w3, b3) \
        .reshape(B, S, out_features)
    assert jnp.allclose(yf, y_ref_f32, atol=1e-1, rtol=1e-1), \
        "mismatch vs f32 reference (beyond bf16 tolerance)"

    # ---- streamed (H-reduction) path + partial last M block masking ----
    # This is the structural path production v7x dims rely on; exercise it at
    # small shapes (M=200 -> 128 + partial 72-row tile, H=512 -> 4 H-steps).
    M2, D2, H2, O2 = 200, 128, 512, 128
    ks = jax.random.split(jax.random.PRNGKey(0), 7)
    x2 = jax.random.normal(ks[0], (M2, D2), dtype=jnp.float32)
    w1s, b1s = lin_init(ks[1], ks[2], D2, H2)
    w2s, b2s = lin_init(ks[3], ks[4], D2, H2)
    w3s, b3s = lin_init(ks[5], ks[6], H2, O2)

    y2 = mlp_forward(x2, w1s, b1s, w2s, b2s, w3s, b3s,
                     force_streamed=True, tm=128, th=128)
    y2 = jax.block_until_ready(y2)
    assert y2.shape == (M2, O2)
    y2_ref = _ref_forward_bf16(x2, w1s, b1s, w2s, b2s, w3s, b3s)
    assert jnp.allclose(y2.astype(jnp.float32), y2_ref, atol=2e-2, rtol=2e-2), \
        "streamed-path mismatch vs bf16-path reference"

    print("KERNEL_OK")
</pallas_src>

<mosaic_0001>
module attributes {stable_mosaic.version = 11 : i64} {
  func.func @_probe_kernel(%arg0: i32, %arg1: memref<8x128xf32, #tpu.memory_space<vmem>>, %arg2: memref<8x128xf32, #tpu.memory_space<vmem>>) attributes {dimension_semantics = [#tpu.dimension_semantics<arbitrary>], iteration_bounds = array<i64: 1>, scalar_prefetch = 0 : i64, scratch_operands = 0 : i64, tpu.core_type = #tpu.core_type<tc>, window_params = [{pipeline_mode = #tpu.pipeline_mode<synchronous>, transform_indices = @transform_0, window_bounds = array<i64: 8, 128>}, {pipeline_mode = #tpu.pipeline_mode<synchronous>, transform_indices = @transform_1, window_bounds = array<i64: 8, 128>}]} {
    %c0 = arith.constant 0 : index
    %c0_0 = arith.constant 0 : index
    %0 = vector.load %arg1[%c0, %c0_0] : memref<8x128xf32, #tpu.memory_space<vmem>>, vector<8x128xf32>
    %cst = arith.constant 1.000000e+00 : f32
    %1 = vector.broadcast %cst : f32 to vector<8x128xf32>
    %2 = arith.addf %0, %1 : vector<8x128xf32>
    %c0_1 = arith.constant 0 : index
    %c0_2 = arith.constant 0 : index
    %3 = vector.load %arg2[%c0_1, %c0_2] : memref<8x128xf32, #tpu.memory_space<vmem>>, vector<8x128xf32>
    tpu.vector_store %arg2[%c0_1, %c0_2], %2 {strides = array<i32>} : memref<8x128xf32, #tpu.memory_space<vmem>>, vector<8x128xf32>,
    return
  }
  func.func @transform_0(%arg0: i32) -> (i32, i32) {
    %c0_i32 = arith.constant 0 : i32
    %c0_i32_0 = arith.constant 0 : i32
    %c0_i32_1 = arith.constant 0 : i32
    return %c0_i32, %c0_i32_0 : i32, i32
  }
  func.func @transform_1(%arg0: i32) -> (i32, i32) {
    %c0_i32 = arith.constant 0 : i32
    %c0_i32_0 = arith.constant 0 : i32
    %c0_i32_1 = arith.constant 0 : i32
    return %c0_i32, %c0_i32_0 : i32, i32
  }
}

module attributes {stable_mosaic.version = 11 : i64} {
  func.func @_mlp_resident_kernel(%arg0: i32, %arg1: memref<16x32xbf16, #tpu.memory_space<vmem>>, %arg2: memref<32x256xbf16, #tpu.memory_space<vmem>>, %arg3: memref<1x256xf32, #tpu.memory_space<vmem>>, %arg4: memref<128x32xbf16, #tpu.memory_space<vmem>>, %arg5: memref<1x32xf32, #tpu.memory_space<vmem>>, %arg6: memref<16x32xbf16, #tpu.memory_space<vmem>>) attributes {dimension_semantics = [#tpu.dimension_semantics<parallel>], iteration_bounds = array<i64: 1>, scalar_prefetch = 0 : i64, scratch_operands = 0 : i64, tpu.core_type = #tpu.core_type<tc>, window_params = [{transform_indices = @transform_0, window_bounds = array<i64: 16, 32>}, {pipeline_mode = #tpu.pipeline_mode<synchronous>, transform_indices = @transform_1, window_bounds = array<i64: 32, 256>}, {pipeline_mode = #tpu.pipeline_mode<synchronous>, transform_indices = @transform_2, window_bounds = array<i64: 1, 256>}, {pipeline_mode = #tpu.pipeline_mode<synchronous>, transform_indices = @transform_3, window_bounds = array<i64: 128, 32>}, {pipeline_mode = #tpu.pipeline_mode<synchronous>, transform_indices = @transform_4, window_bounds = array<i64: 1, 32>}, {transform_indices = @transform_5, window_bounds = array<i64: 16, 32>}]} {
    %c0 = arith.constant 0 : index
    %c0_0 = arith.constant 0 : index
    %0 = vector.load %arg1[%c0, %c0_0] : memref<16x32xbf16, #tpu.memory_space<vmem>>, vector<16x32xbf16>
    %c0_1 = arith.constant 0 : index
    %c0_2 = arith.constant 0 : index
    %1 = vector.load %arg2[%c0_1, %c0_2] : memref<32x256xbf16, #tpu.memory_space<vmem>>, vector<32x256xbf16>
    %cst = arith.constant dense<0.000000e+00> : vector<16x256xf32>
    %2 = tpu.matmul %0, %1, %cst {dimension_numbers = #tpu.dot_dimension_numbers<[1], [0], [0], [1], [0, 0, 1, 1], [], []>} : vector<16x32xbf16>, vector<32x256xbf16>, vector<16x256xf32> -> vector<16x256xf32>
    %c0_3 = arith.constant 0 : index
    %c0_4 = arith.constant 0 : index
    %3 = vector.load %arg3[%c0_3, %c0_4] : memref<1x256xf32, #tpu.memory_space<vmem>>, vector<1x256xf32>
    %4 = vector.broadcast %3 : vector<1x256xf32> to vector<16x256xf32>
    %5 = arith.addf %2, %4 : vector<16x256xf32>
    %6 = vector.extract_strided_slice %5 {offsets = [0, 0], sizes = [16, 128], strides = [1, 1]} : vector<16x256xf32> to vector<16x128xf32>
    %7 = vector.extract_strided_slice %5 {offsets = [0, 128], sizes = [16, 128], strides = [1, 1]} : vector<16x256xf32> to vector<16x128xf32>
    %cst_5 = arith.constant 0.000000e+00 : f32
    %8 = vector.broadcast %cst_5 : f32 to vector<16x128xf32>
    %9 = arith.subf %8, %6 : vector<16x128xf32>
    %10 = math.exp %9 : vector<16x128xf32>
    %cst_6 = arith.constant 1.000000e+00 : f32
    %11 = vector.broadcast %cst_6 : f32 to vector<16x128xf32>
    %12 = arith.addf %11, %10 : vector<16x128xf32>
    %13 = tpu.reciprocal %12 {approx = true} : vector<16x128xf32> -> vector<16x128xf32>
    %14 = arith.mulf %6, %13 : vector<16x128xf32>
    %15 = arith.mulf %14, %7 : vector<16x128xf32>
    %16 = arith.truncf %15 : vector<16x128xf32> to vector<16x128xbf16>
    %c0_7 = arith.constant 0 : index
    %c0_8 = arith.constant 0 : index
    %17 = vector.load %arg4[%c0_7, %c0_8] : memref<128x32xbf16, #tpu.memory_space<vmem>>, vector<128x32xbf16>
    %cst_9 = arith.constant dense<0.000000e+00> : vector<16x32xf32>
    %18 = tpu.matmul %16, %17, %cst_9 {dimension_numbers = #tpu.dot_dimension_numbers<[1], [0], [0], [1], [0, 0, 1, 1], [], []>} : vector<16x128xbf16>, vector<128x32xbf16>, vector<16x32xf32> -> vector<16x32xf32>
    %c0_10 = arith.constant 0 : index
    %c0_11 = arith.constant 0 : index
    %19 = vector.load %arg5[%c0_10, %c0_11] : memref<1x32xf32, #tpu.memory_space<vmem>>, vector<1x32xf32>
    %20 = vector.broadcast %19 : vector<1x32xf32> to vector<16x32xf32>
    %21 = arith.addf %18, %20 : vector<16x32xf32>
    %22 = arith.truncf %21 : vector<16x32xf32> to vector<16x32xbf16>
    %c0_12 = arith.constant 0 : index
    %c0_13 = arith.constant 0 : index
    %23 = vector.load %arg6[%c0_12, %c0_13] : memref<16x32xbf16, #tpu.memory_space<vmem>>, vector<16x32xbf16>
    tpu.vector_store %arg6[%c0_12, %c0_13], %22 {strides = array<i32>} : memref<16x32xbf16, #tpu.memory_space<vmem>>, vector<16x32xbf16>,
    return
  }
  func.func @transform_0(%arg0: i32) -> (i32, i32) {
    %c0_i32 = arith.constant 0 : i32
    %c0_i32_0 = arith.constant 0 : i32
    return %arg0, %c0_i32 : i32, i32
  }
  func.func @transform_1(%arg0: i32) -> (i32, i32) {
    %c0_i32 = arith.constant 0 : i32
    %c0_i32_0 = arith.constant 0 : i32
    %c0_i32_1 = arith.constant 0 : i32
    return %c0_i32, %c0_i32_0 : i32, i32
  }
  func.func @transform_2(%arg0: i32) -> (i32, i32) {
    %c0_i32 = arith.constant 0 : i32
    %c0_i32_0 = arith.constant 0 : i32
    %c0_i32_1 = arith.constant 0 : i32
    return %c0_i32, %c0_i32_0 : i32, i32
  }
  func.func @transform_3(%arg0: i32) -> (i32, i32) {
    %c0_i32 = arith.constant 0 : i32
    %c0_i32_0 = arith.constant 0 : i32
    %c0_i32_1 = arith.constant 0 : i32
    return %c0_i32, %c0_i32_0 : i32, i32
  }
  func.func @transform_4(%arg0: i32) -> (i32, i32) {
    %c0_i32 = arith.constant 0 : i32
    %c0_i32_0 = arith.constant 0 : i32
    %c0_i32_1 = arith.constant 0 : i32
    return %c0_i32, %c0_i32_0 : i32, i32
  }
  func.func @transform_5(%arg0: i32) -> (i32, i32) {
    %c0_i32 = arith.constant 0 : i32
    %c0_i32_0 = arith.constant 0 : i32
    return %arg0, %c0_i32 : i32, i32
  }
}

</mosaic_0001>

<bundles_post_ra>
// kernel: tpu_custom_call.1
= control target key start
LH: loop header
LB: loop body
LE: loop exit
PB: predicated region body
PF: predicated region fallthrough
CT: control target
= control target key end

     0   :  { %6 = vsyncpa [#allocation3], 0  ;;  %s103_s0 = inlined_call_operand.hbm [shape: f32[8,128], index: 0, kind: input, shape index: {}]   ;;  %s104_s1 = inlined_call_operand.hbm [shape: f32[8,128], index: 1, kind: output, shape index: {}]  }
   0x1   :  { %7 = vsyncpa [#allocation4], 0  ;;  %s85_s6 = smov [#allocation2]  }
   0x2   :  { %s14_s7 = sshll.u32 %s85_s6, 4  ;;  %s15_s7 = int_to_ptr.vmem [resolvable:$true] %s14_s7 }
   0x3   :  { %s49_s8 = scalar_lea.vmem %s15_s7, 128  ;;  %p54_p1 = scmp.lt.s32.totalorder %s15_s7, %s15_s7 }
   0x4   :  { %p50_p0 = scmp.ne.s32.totalorder %s15_s7, %s49_s8  ;;  %p55_p2 = scmp.lt.s32.totalorder %s49_s8, %s49_s8 }
   0x6   :  { %p56_p3 = por %p55_p2, %p54_p1 }
   0x8   :  { %p57_p4 = pnand %p56_p3, %p50_p0 }
   0xa   :  { %60 = shalt.err (!%p57_p4)
}
   0xb   :  { %17 = dma.hbm_to_vmem [thread:$0]  %s103_s0, 128, %s15_s7, [#allocation3]  }
   0xc   :  { %81 = dma.done.wait [#allocation3], 128  }
   0xd   :  { %82 = vsyncadd [#allocation3], 4294967168  ;;  %s86_s11 = smov [#allocation5]   ;;  %v21_v0 = vld [vmem:[#allocation2] sm:$0xff] }
   0xe   :  { %s30_s12 = sshll.u32 %s86_s11, 4  ;;  %v22_v1 = vadd.f32 1.0, %v21_v0  ;;  %s31_s12 = int_to_ptr.vmem [resolvable:$true] %s30_s12 }
   0xf   :  { %s61_s13 = scalar_lea.vmem %s31_s12, 128  ;;  %p66_p6 = scmp.lt.s32.totalorder %s31_s12, %s31_s12 }
  0x10   :  { %23 = vst [vmem:[#allocation5] sm:$0xff] %v22_v1  ;;  %p62_p5 = scmp.ne.s32.totalorder %s31_s12, %s61_s13  ;;  %p67_p7 = scmp.lt.s32.totalorder %s61_s13, %s61_s13 }
  0x12   :  { %p68_p8 = por %p67_p7, %p66_p6 }
  0x14   :  { %p69_p9 = pnand %p68_p8, %p62_p5 }
  0x16   :  { %72 = shalt.err (!%p69_p9)
}
  0x17   :  { %33 = dma.vmem_to_hbm [thread:$0]  %s31_s12, 128, %s104_s1, [#allocation4]  }
  0x18   :  { %83 = dma.done.wait [#allocation4], 128  }
  0x19   :  { %84 = vsyncadd [#allocation4], 4294967168 }
  0x1a   :  { %37 = vsyncpa [#allocation3], 1 }
  0x1b   :  { %38 = vsyncpa [#allocation4], 1 }

// kernel: tpu_custom_call.1
= control target key start
LH: loop header
LB: loop body
LE: loop exit
PB: predicated region body
PF: predicated region fallthrough
CT: control target
= control target key end

     0   :  { %v365_v2 = vmov 0   ;;  %vm65_vm0 = vcmask 261120   ;;  %s449_s0 = inlined_call_operand.vmem [shape: bf16[16,32], index: 0, kind: input, shape index: {}]   ;;  %s450_s1 = inlined_call_operand.vmem [shape: bf16[32,256], index: 1, kind: input, shape index: {}]   ;;  %s451_s2 = inlined_call_operand.vmem [shape: f32[1,256], index: 2, kind: input, shape index: {}]   ;;  %s452_s3 = inlined_call_operand.vmem [shape: bf16[128,32], index: 3, kind: input, shape index: {}]   ;;  %s453_s4 = inlined_call_operand.vmem [shape: f32[1,32], index: 4, kind: input, shape index: {}]   ;;  %s454_s5 = inlined_call_operand.hbm [shape: bf16[16,32], index: 5, kind: output, shape index: {}]  }
   0x1   :  { %v320_v0 = vld [vmem:[%s450_s1 + $0x14] ss:$8 sps:$4 sm:$0xff]   ;;  %v322_v1 = vld [vmem:[%s450_s1 + $0x10] ss:$8 sps:$4 sm:$0xff]   ;;  %101 = vmatprep.mubr.bf16.mxu0 %v365_v2  ;;  %v323_v3 = vld [vmem:[%s450_s1 + $0x4] ss:$8 sps:$4 sm:$0xff]  }
   0x2   :  { %81 = vmatprep.subr.bf16.mxu0 %v320_v0  ;;  %v325_v4 = vld [vmem:[%s450_s1] ss:$8 sps:$4 sm:$0xff]  }
   0x3   :  { %82 = vmatpush1.bf16.msra.mxu0 %v322_v1  ;;  %v326_v5 = vld [vmem:[%s449_s0] sm:$0xff]  }
   0x4   :  { %83 = vmatprep.subr.bf16.mxu0 %v323_v3 }
   0x7   :  { %84 = vmatpush1.bf16.msra.mxu0 %v325_v4 }
   0x8   :  { %10 = vsyncpa [#allocation3], 0  ;;  %v327_v6 = vld [vmem:[%s452_s3 + $0x38] sm:$0xff]   ;;  %v366_v7 = vmov 0.0   ;;  %v328_v8 = vld [vmem:[%s452_s3 + $0x30] sm:$0xff]   ;;  %vm367_vm1 = vmmov 0   ;;  %v30_v15 = vlaneseq }
   0x9   :  { %294 = vmatprep.subr.bf16.mxu1 %v366_v7  ;;  %v329_v9 = vld [vmem:[%s452_s3 + $0x28] sm:$0xff]   ;;  %v330_v10 = vld [vmem:[%s452_s3 + $0x20] sm:$0xff]   ;;  %v331_v11 = vld [vmem:[%s452_s3 + $0x18] sm:$0xff]   ;;  %310 = vmatprep.mubr.msk.bf16.mxu1 %vm367_vm1, %v366_v7  ;;  %vm247_vm2 = vcmask 257024   ;;  %s368_s19 = smov [#allocation2]  }
   0xa   :  { %271 = vmatmul.mubr.msk.bf16.vlgmr.msra.gmra.mxu0 %vm65_vm0, %v326_v5  ;;  %295 = vmatpush3.bf16.msra.mxu1 %v327_v6  ;;  %v332_v12 = vld [vmem:[%s452_s3 + $0x10] sm:$0xff]   ;;  %v333_v13 = vld [vmem:[%s452_s3 + $0x8] sm:$0xff]   ;;  %v334_v14 = vld [vmem:[%s452_s3] sm:$0xff]   ;;  %v31_v16 = vshrl.u32 %v30_v15, 7  ;;  %s255_s20 = sshll.u32 %s368_s19, 4  ;;  %s256_s20 = int_to_ptr.vmem [resolvable:$true] %s255_s20 }
   0xb   :  { %296 = vmatprep.subr.bf16.mxu1 %v366_v7  ;;  %v28_v18 = vld [vmem:[%s451_s2] sm:$0x3]  ;;  %s343_s21 = scalar_lea.vmem %s256_s20, 128  ;;  %p348_p1 = scmp.lt.s32.totalorder %s256_s20, %s256_s20 }
   0xc   :  { %v32_v17 = vsub.s32 0, %v31_v16  ;;  %v36_v33 = vsub.s32 1, %v31_v16  ;;  %v272_v45 = vld [vmem:[%s453_s4] ss:$0 sm:$0xff]  ;;  %p344_p0 = scmp.ne.s32.totalorder %s256_s20, %s343_s21  ;;  %p349_p2 = scmp.lt.s32.totalorder %s343_s21, %s343_s21 }
   0xe   :  { %297 = vmatpush3.bf16.msra.mxu1 %v328_v8  ;;  %v33_v19 = vrot.slane %v28_v18, %v32_v17  ;;  %v37_v35 = vrot.slane %v28_v18, %v36_v33  ;;  %p350_p3 = por %p349_p2, %p348_p1 }
   0xf   :  { %298 = vmatprep.subr.bf16.mxu1 %v366_v7 }
  0x10   :  { %p351_p4 = pnand %p350_p3, %p344_p0 }
  0x12   :  { %299 = vmatpush3.bf16.msra.mxu1 %v329_v9 }
  0x13   :  { %300 = vmatprep.subr.bf16.mxu1 %v366_v7 }
  0x16   :  { %301 = vmatpush3.bf16.msra.mxu1 %v330_v10 }
  0x17   :  { %302 = vmatprep.subr.bf16.mxu1 %v366_v7 }
  0x1a   :  { %303 = vmatpush3.bf16.msra.mxu1 %v331_v11 }
  0x1b   :  { %304 = vmatprep.subr.bf16.mxu1 %v366_v7 }
  0x1e   :  { %305 = vmatpush3.bf16.msra.mxu1 %v332_v12 }
  0x1f   :  { %306 = vmatprep.subr.bf16.mxu1 %v366_v7 }
  0x22   :  { %307 = vmatpush3.bf16.msra.mxu1 %v333_v13 }
  0x23   :  { %308 = vmatprep.subr.bf16.mxu1 %v366_v7 }
  0x26   :  { %309 = vmatpush3.bf16.msra.mxu1 %v334_v14 }
  0xca   :  { %v103_v20 = vpop.f32.mrf.mxu0 }
  0xcb   :  { %v104_v21 = vadd.f32 %v103_v20, %v33_v19 }
  0xcc   :  { %v105_v22 = vpop.f32.mrf.mxu0 }
  0xcd   :  { %v112_v23 = vsub.f32 0.0, %v104_v21  ;;  %v106_v39 = vadd.f32 %v105_v22, %v37_v35 }
  0xce   :  { %v107_v24 = vpop.f32.mrf.mxu0 }
  0xcf   :  { %v114_v25 = vmul.f32 1.442695, %v112_v23  ;;  %v108_v26 = vadd.f32 %v107_v24, %v33_v19 }
  0xd0   :  { %v109_v36 = vpop.f32.mrf.mxu0 }
  0xd1   :  { %335 = vpow2.f32 %v114_v25  ;;  %v113_v27 = vsub.f32 0.0, %v108_v26  ;;  %v110_v41 = vadd.f32 %v109_v36, %v37_v35 }
  0xd3   :  { %v116_v28 = vmul.f32 1.442695, %v113_v27 }
  0xd5   :  { %337 = vpow2.f32 %v116_v28 }
  0xde   :  { %v336_v29 = vpop.eup %335 }
  0xdf   :  { %v118_v30 = vadd.f32 1.0, %v336_v29 }
  0xe1   :  { %339 = vrcp.f32 %v118_v30 }
  0xe2   :  { %v338_v31 = vpop.eup %337 }
  0xe3   :  { %v119_v32 = vadd.f32 1.0, %v338_v31 }
  0xe5   :  { %341 = vrcp.f32 %v119_v32 }
  0xee   :  { %v340_v34 = vpop.eup %339 }
  0xef   :  { %v122_v37 = vmul.f32 %v340_v34, %v104_v21 }
  0xf1   :  { %v124_v42 = vmul.f32 %v122_v37, %v106_v39 }
  0xf2   :  { %v342_v38 = vpop.eup %341 }
  0xf3   :  { %v123_v40 = vmul.f32 %v342_v38, %v108_v26 }
  0xf5   :  { %v125_v43 = vmul.f32 %v123_v40, %v110_v41 }
  0xf7   :  { %v126_v44 = vpack.c.bf16 %v125_v43, %v124_v42 }
  0xf9   :  { %311 = vmatmul.mubr.bf16.vlgmr.msra.gmra.mxu1 %v126_v44 }
 0x1b9   :  { %v232_v46 = vpop.f32.mrf.mxu1 }
 0x1ba   :  { %v233_v47 = vadd.f32 %v272_v45, %v232_v46 }
 0x1bb   :  { %v312_v48 = vpop.f32.mrf.mxu1 }
 0x1bc   :  { %v283_v49 = vpack.c.bf16 %v233_v47, %v233_v47 }
 0x1bd   :  { %v235_v50 = vpop.f32.mrf.mxu1 }
 0x1be   :  { %248 = vst.msk [vmem:[#allocation2] sm:$0xf] %vm247_vm2, %v283_v49  ;;  %v236_v51 = vadd.f32 %v272_v45, %v235_v50 }
 0x1bf   :  { %v313_v52 = vpop.f32.mrf.mxu1 }
 0x1c0   :  { %v284_v53 = vpack.c.bf16 %v236_v51, %v236_v51 }
 0x1c2   :  { %249 = vst.msk [vmem:[#allocation2 + $0x4] sm:$0xf] %vm247_vm2, %v284_v53 }
 0x1c3   :  { %354 = shalt.err (!%p351_p4)
}
 0x1c4   :  { %s369_s4 = smov 64   ;;  %s370_s22 = smov 4  }
 0x1c5   :  { %261 = dma.vmem_to_hbm [thread:$0]  %s256_s20, 128, %s454_s5, [#allocation3], %s369_s4, %s369_s4, %s370_s22  }
 0x1c6   :  { %363 = dma.done.wait [#allocation3], 128  }
 0x1c7   :  { %364 = vsyncadd [#allocation3], 4294967168 }
 0x1c8   :  { %265 = vsyncpa [#allocation3], 1 }

</bundles_post_ra>
